<compile_context>
chip_gen: v7x
topology: tpu7x:2x2x1
jax: 0.10.0
libtpu: 0.0.40
codegen_flags: <defaults>
</compile_context>

<pallas_src>
import functools

import jax
import jax.numpy as jnp
from jax.experimental import pallas as pl
from jax.experimental.pallas import tpu as pltpu


# ---------------------------------------------------------------------------
# Tiling / budgeting helpers
# ---------------------------------------------------------------------------
def _sublane_pack(itemsize: int) -> int:
    """Rows per packed sublane group: 8 for 4-byte, 16 for 2-byte, 32 for 1-byte."""
    return max(8, 32 // max(1, itemsize))


def _vmem_plan():
    """Return (per-input-block byte cap, scoped-VMEM limit) for this TPU generation."""
    try:
        vmem = int(pltpu.get_tpu_info().vmem_capacity_bytes)
    except Exception:
        vmem = 64 * 1024 * 1024  # conservative default (v7x-class)
    if vmem >= 96 * 1024 * 1024:          # v5e / v6e: 128 MiB physical VMEM
        return 8 * 1024 * 1024, 64 * 1024 * 1024
    else:                                 # v7x: 64 MiB per TensorCore
        return 5 * 1024 * 1024, 32 * 1024 * 1024


def _choose_tiles(B, R, D, itemsize, cap_bytes):
    """Pick (TB, TR, TD, pack): full-D, full-R blocks preferred; tile R then D."""
    pack = _sublane_pack(itemsize)
    tb_min = B if B <= pack else pack

    def fits(tb, tr, td):
        return tb * tr * td * itemsize <= cap_bytes

    tr, td = R, D
    if not fits(tb_min, tr, td):
        # 1) tile the reduction axis R (rows stay contiguous, output stays full-D)
        tr = cap_bytes // max(1, tb_min * td * itemsize)
        tr = max(pack, (tr // pack) * pack)
        tr = min(tr, R)
        if not fits(tb_min, tr, td):
            # 2) last resort: tile D on a 128-lane boundary
            tr = min(R, pack)
            td = cap_bytes // max(1, tb_min * tr * itemsize)
            td = max(128, (td // 128) * 128)
            td = min(td, D)

    # Grow the batch tile to fill the budget (multiple of the sublane pack).
    if B <= pack:
        tb = B
    else:
        tb = cap_bytes // max(1, tr * td * itemsize)
        tb = max(pack, (tb // pack) * pack)
        tb = min(tb, (B // pack) * pack)

    # Megacore / pipelining: guarantee >= 2 blocks along a parallel axis when
    # the whole problem would otherwise be a single grid step.
    if B > pack and pl.cdiv(B, tb) == 1 and pl.cdiv(D, td) == 1:
        half = (((B + 1) // 2) + pack - 1) // pack * pack
        tb = min(tb, max(pack, half))
        tb = min(tb, (B // pack) * pack)

    return tb, tr, td, pack


def _choose_chunks(tb, tr, td, pack, temp_cap_bytes=512 * 1024):
    """In-kernel chunk sizes (cb rows x rb rules) so f32 temporaries stay small."""
    cb = min(tb, pack)
    rb = min(tr, pack)
    while cb * rb * td * 4 > temp_cap_bytes and rb > 1:
        rb = max(1, rb // 2)
    while cb * rb * td * 4 > temp_cap_bytes and cb > 1:
        cb = max(1, cb // 2)
    return cb, rb


# ---------------------------------------------------------------------------
# Kernels
# ---------------------------------------------------------------------------
def _rowchunk_sum(x_ref, b0, bs, rb, r_base, r_total, need_mask):
    """f32 sum over the block's full R extent for rows [b0, b0+bs)."""
    tr, td = x_ref.shape[1], x_ref.shape[2]
    acc = None
    for r0 in range(0, tr, rb):
        rs = min(rb, tr - r0)
        xc = x_ref[b0:b0 + bs, r0:r0 + rs, :].astype(jnp.float32)
        if need_mask:
            rows = jax.lax.broadcasted_iota(jnp.int32, (rs, td), 0) + r0
            keep = (rows + r_base) < r_total
            xc = jnp.where(keep[None, :, :], xc, 0.0)
        s = jnp.sum(xc, axis=1)
        acc = s if acc is None else acc + s
    return acc


def _defuzz_kernel_single(x_ref, o_ref, *, inv_r, cb, rb):
    """Whole R fits in one block: stream chunks, keep accumulator in vregs."""
    tb = x_ref.shape[0]
    for b0 in range(0, tb, cb):
        bs = min(cb, tb - b0)
        acc = _rowchunk_sum(x_ref, b0, bs, rb, 0, 0, False)
        o_ref[b0:b0 + bs, :] = (acc * inv_r).astype(o_ref.dtype)


def _defuzz_kernel_multi(x_ref, o_ref, acc_ref, *, inv_r, r_total, need_mask, cb, rb):
    """R is tiled: accumulate into a VMEM f32 scratch across the 'arbitrary' axis."""
    r_idx = pl.program_id(2)
    tb, tr = x_ref.shape[0], x_ref.shape[1]

    @pl.when(r_idx == 0)
    def _():
        acc_ref[...] = jnp.zeros_like(acc_ref)

    r_base = r_idx * tr
    for b0 in range(0, tb, cb):
        bs = min(cb, tb - b0)
        part = _rowchunk_sum(x_ref, b0, bs, rb, r_base, r_total, need_mask)
        acc_ref[b0:b0 + bs, :] = acc_ref[b0:b0 + bs, :] + part

    @pl.when(r_idx == pl.num_programs(2) - 1)
    def _():
        o_ref[...] = (acc_ref[...] * inv_r).astype(o_ref.dtype)


# ---------------------------------------------------------------------------
# Wrapper
# ---------------------------------------------------------------------------
def defuzz(x: jax.Array, *, min_pallas_bytes: int = 256 * 1024,
           block_cap_bytes: int | None = None) -> jax.Array:
    """Pallas TPU implementation of torch.mean(x, dim=1) for x of shape (B, R, D)."""
    B, R, D = x.shape
    itemsize = jnp.dtype(x.dtype).itemsize

    # Tiny inputs: fixed pallas_call launch/pipeline overhead dominates.
    if B * R * D * itemsize < min_pallas_bytes:
        return jnp.mean(x.astype(jnp.float32), axis=1).astype(x.dtype)

    cap_bytes, vmem_limit = _vmem_plan()
    if block_cap_bytes is not None:
        cap_bytes = block_cap_bytes
    tb, tr, td, pack = _choose_tiles(B, R, D, itemsize, cap_bytes)
    cb, rb = _choose_chunks(tb, tr, td, pack)

    grid_b, grid_d, n_r = pl.cdiv(B, tb), pl.cdiv(D, td), pl.cdiv(R, tr)
    inv_r = float(1.0 / R)

    cost = pl.CostEstimate(
        flops=B * R * D,
        transcendentals=0,
        bytes_accessed=(B * R * D + B * D) * itemsize,
    )

    if n_r == 1:
        kernel = functools.partial(_defuzz_kernel_single, inv_r=inv_r, cb=cb, rb=rb)
        grid_spec = pltpu.PrefetchScalarGridSpec(
            num_scalar_prefetch=0,
            grid=(grid_b, grid_d),
            in_specs=[pl.BlockSpec((tb, tr, td), lambda b, d: (b, 0, d))],
            out_specs=pl.BlockSpec((tb, td), lambda b, d: (b, d)),
        )
        dims = ("parallel", "parallel")
    else:
        need_mask = (R % tr) != 0
        kernel = functools.partial(
            _defuzz_kernel_multi, inv_r=inv_r, r_total=R,
            need_mask=need_mask, cb=cb, rb=rb)
        grid_spec = pltpu.PrefetchScalarGridSpec(
            num_scalar_prefetch=0,
            grid=(grid_b, grid_d, n_r),               # reduction axis last
            in_specs=[pl.BlockSpec((tb, tr, td), lambda b, d, r: (b, r, d))],
            out_specs=pl.BlockSpec((tb, td), lambda b, d, r: (b, d)),
            scratch_shapes=[pltpu.VMEM((tb, td), jnp.float32)],
        )
        dims = ("parallel", "parallel", "arbitrary")

    return pl.pallas_call(
        kernel,
        out_shape=jax.ShapeDtypeStruct((B, D), x.dtype),
        grid_spec=grid_spec,
        compiler_params=pltpu.CompilerParams(
            dimension_semantics=dims,
            vmem_limit_bytes=vmem_limit,
        ),
        cost_estimate=cost,
    )(x)


if __name__ == "__main__":
    # DefuzzLayer has no parameters (__init__ is empty) -> nothing to initialize.
    key = jax.random.PRNGKey(0)

    # 1) Small shape consistent with the module: (batch, num_fuzzy_rules, features).
    #    Force the Pallas path (the size-based fallback would otherwise kick in).
    B, R, D = 2, 8, 128
    x = jax.random.normal(key, (B, R, D), dtype=jnp.float32)
    y = jax.block_until_ready(defuzz(x, min_pallas_bytes=0))
    y_ref = jnp.mean(x, axis=1)
    assert y.shape == (B, D), y.shape
    assert jnp.allclose(y, y_ref, atol=1e-5, rtol=1e-5), "mismatch (single-block path)"

    # 2) Multi-block batch path: B > pack with ragged last B block, non-128-aligned D.
    x2 = jax.random.normal(jax.random.PRNGKey(0), (20, 8, 96), dtype=jnp.float32)
    y2 = jax.block_until_ready(defuzz(x2, min_pallas_bytes=0))
    assert y2.shape == (20, 96), y2.shape
    assert jnp.allclose(y2, jnp.mean(x2, axis=1), atol=1e-5, rtol=1e-5), \
        "mismatch (multi-batch-block path)"

    # 3) R-tiled (reduction grid axis) path with a ragged/masked last R block,
    #    exercised at a small shape by overriding the per-block byte cap.
    x3 = jax.random.normal(jax.random.PRNGKey(0), (16, 37, 256), dtype=jnp.float32)
    y3 = jax.block_until_ready(defuzz(x3, min_pallas_bytes=0, block_cap_bytes=64 * 1024))
    assert y3.shape == (16, 256), y3.shape
    assert jnp.allclose(y3, jnp.mean(x3, axis=1), atol=1e-5, rtol=1e-5), \
        "mismatch (R-tiled / masked path)"

    # 4) Tiny-input fallback path (default threshold).
    y4 = jax.block_until_ready(defuzz(x))
    assert jnp.allclose(y4, y_ref, atol=1e-5, rtol=1e-5), "mismatch (fallback path)"

    print("KERNEL_OK")
</pallas_src>

<mosaic_0001>
module attributes {stable_mosaic.version = 11 : i64} {
  func.func @_defuzz_kernel_single(%arg0: i32, %arg1: i32, %arg2: memref<2x8x128xf32, #tpu.memory_space<vmem>>, %arg3: memref<2x128xf32, #tpu.memory_space<vmem>>) attributes {dimension_semantics = [#tpu.dimension_semantics<parallel>, #tpu.dimension_semantics<parallel>], iteration_bounds = array<i64: 1, 1>, scalar_prefetch = 0 : i64, scratch_operands = 0 : i64, tpu.core_type = #tpu.core_type<tc>, window_params = [{transform_indices = @transform_0, window_bounds = array<i64: 2, 8, 128>}, {transform_indices = @transform_1, window_bounds = array<i64: 2, 128>}]} {
    %c0 = arith.constant 0 : index
    %c0_0 = arith.constant 0 : index
    %c0_1 = arith.constant 0 : index
    %0 = vector.load %arg2[%c0, %c0_0, %c0_1] : memref<2x8x128xf32, #tpu.memory_space<vmem>>, vector<2x8x128xf32>
    %cst = arith.constant dense<0.000000e+00> : vector<2x128xf32>
    %1 = vector.multi_reduction <add>, %0, %cst [1] : vector<2x8x128xf32> to vector<2x128xf32>
    %cst_2 = arith.constant 1.250000e-01 : f32
    %2 = vector.broadcast %cst_2 : f32 to vector<2x128xf32>
    %3 = arith.mulf %1, %2 : vector<2x128xf32>
    %c0_3 = arith.constant 0 : index
    %c0_4 = arith.constant 0 : index
    %4 = vector.load %arg3[%c0_3, %c0_4] : memref<2x128xf32, #tpu.memory_space<vmem>>, vector<2x128xf32>
    tpu.vector_store %arg3[%c0_3, %c0_4], %3 {strides = array<i32>} : memref<2x128xf32, #tpu.memory_space<vmem>>, vector<2x128xf32>,
    return
  }
  func.func @transform_0(%arg0: i32, %arg1: i32) -> (i32, i32, i32) {
    %c0_i32 = arith.constant 0 : i32
    %c0_i32_0 = arith.constant 0 : i32
    return %arg0, %c0_i32, %arg1 : i32, i32, i32
  }
  func.func @transform_1(%arg0: i32, %arg1: i32) -> (i32, i32) {
    %c0_i32 = arith.constant 0 : i32
    return %arg0, %arg1 : i32, i32
  }
}

</mosaic_0001>

<bundles_post_ra>
// kernel: tpu_custom_call.1
= control target key start
LH: loop header
LB: loop body
LE: loop exit
PB: predicated region body
PF: predicated region fallthrough
CT: control target
= control target key end

     0   :  { %6 = vsyncpa [#allocation3], 0  ;;  %s150_s0 = inlined_call_operand.hbm [shape: f32[2,8,128], index: 0, kind: input, shape index: {}]   ;;  %s151_s1 = inlined_call_operand.hbm [shape: f32[2,128], index: 1, kind: output, shape index: {}]  }
   0x1   :  { %7 = vsyncpa [#allocation4], 0  ;;  %s112_s6 = smov [#allocation2]   ;;  %s64_s10 = scalar_lea.hbm %s150_s0, 256 }
   0x2   :  { %s13_s7 = sshll.u32 %s112_s6, 4  ;;  %p65_p0 = scmp.ne.s32.totalorder %s150_s0, %s64_s10  ;;  %s14_s7 = int_to_ptr.vmem [resolvable:$true] %s13_s7 }
   0x3   :  { %p68_p1 = scmp.lt.u32.totalorder %s64_s10, %s150_s0 }
   0x5   :  { %p70_p2 = pnand %p68_p1, %p65_p0 }
   0x7   :  { %73 = shalt.err (!%p70_p2)
}
   0x8   :  { %s74_s15 = scalar_lea.vmem %s14_s7, 256  ;;  %p79_p4 = scmp.lt.s32.totalorder %s14_s7, %s14_s7 }
   0x9   :  { %p75_p3 = scmp.ne.s32.totalorder %s14_s7, %s74_s15  ;;  %p80_p5 = scmp.lt.s32.totalorder %s74_s15, %s74_s15 }
   0xb   :  { %p81_p6 = por %p80_p5, %p79_p4 }
   0xd   :  { %p82_p7 = pnand %p81_p6, %p75_p3 }
   0xf   :  { %85 = shalt.err (!%p82_p7)
}
  0x10   :  { %s113_s16 = smov 128   ;;  %s114_s17 = smov 8  }
  0x11   :  { %19 = dma.hbm_to_vmem [thread:$0]  %s150_s0, 256, %s14_s7, [#allocation3], %s113_s16, %s113_s16, %s114_s17  }
  0x12   :  { %108 = dma.done.wait [#allocation3], 256  }
  0x13   :  { %109 = vsyncadd [#allocation3], 4294967040  ;;  %v23_v0 = vld [vmem:[#allocation2] sm:$0xff]  ;;  %v24_v1 = vld [vmem:[#allocation2 + $0x8] sm:$0xff]  ;;  %s115_s20 = smov [#allocation5]   ;;  %vm41_vm0 = vcmask 1041409  }
  0x14   :  { %v25_v2 = vrot.slane %v23_v0, 4  ;;  %v31_v3 = vrot.slane %v24_v1, 4  ;;  %s51_s21 = sshll.u32 %s115_s20, 4  ;;  %s52_s21 = int_to_ptr.vmem [resolvable:$true] %s51_s21 }
  0x15   :  { %s86_s0 = scalar_lea.vmem %s52_s21, 32  ;;  %p91_p9 = scmp.lt.s32.totalorder %s52_s21, %s52_s21 }
  0x16   :  { %v26_v4 = vadd.f32 %v25_v2, %v23_v0  ;;  %v32_v5 = vadd.f32 %v31_v3, %v24_v1  ;;  %p87_p8 = scmp.ne.s32.totalorder %s52_s21, %s86_s0  ;;  %p92_p10 = scmp.lt.s32.totalorder %s86_s0, %s86_s0 }
  0x18   :  { %v27_v6 = vrot.slane %v26_v4, 2  ;;  %v33_v7 = vrot.slane %v32_v5, 2  ;;  %p93_p11 = por %p92_p10, %p91_p9 }
  0x1a   :  { %v28_v8 = vadd.f32 %v27_v6, %v26_v4  ;;  %v34_v9 = vadd.f32 %v33_v7, %v32_v5  ;;  %p94_p12 = pnand %p93_p11, %p87_p8 }
  0x1c   :  { %v29_v10 = vrot.slane %v28_v8, 1  ;;  %v35_v11 = vrot.slane %v34_v9, 1 }
  0x1e   :  { %v30_v12 = vadd.f32 %v29_v10, %v28_v8  ;;  %v36_v13 = vadd.f32 %v35_v11, %v34_v9 }
  0x20   :  { %v37_v14 = vmul.f32 0.125, %v30_v12  ;;  %v38_v15 = vmul.f32 0.125, %v36_v13 }
  0x22   :  { %v42_v16 = vsel %vm41_vm0, %v38_v15, %v37_v14 }
  0x23   :  { %44 = vst [vmem:[#allocation5] sm:$0x3] %v42_v16 }
  0x24   :  { %97 = shalt.err (!%p94_p12)
}
  0x25   :  { %s98_s24 = scalar_lea.hbm %s151_s1, 32 }
  0x26   :  { %p99_p13 = scmp.ne.s32.totalorder %s151_s1, %s98_s24  ;;  %p102_p0 = scmp.lt.u32.totalorder %s98_s24, %s151_s1 }
  0x28   :  { %p104_p1 = pnand %p102_p0, %p99_p13 }
  0x2a   :  { %107 = shalt.err (!%p104_p1)
}
  0x2b   :  { %54 = dma.vmem_to_hbm [thread:$0]  %s52_s21, 32, %s151_s1, [#allocation4]  }
  0x2c   :  { %110 = dma.done.wait [#allocation4], 32  }
  0x2d   :  { %111 = vsyncadd [#allocation4], 4294967264 }
  0x2e   :  { %58 = vsyncpa [#allocation3], 1 }
  0x2f   :  { %59 = vsyncpa [#allocation4], 1 }

</bundles_post_ra>
